<compile_context>
chip_gen: v5e
topology: v5e:2x2
jax: 0.10.0
libtpu: 0.0.40
codegen_flags: <defaults>
</compile_context>

<pallas_src>
import jax
import jax.numpy as jnp
from jax.experimental import pallas as pl
from jax.experimental.pallas import tpu as pltpu


def _round_up(x: int, m: int) -> int:
    return ((x + m - 1) // m) * m


def _linear_kernel_single_k(x_ref, w_ref, b_ref, o_ref):
    """Full K in one tile: one MXU push + bias add. No scratch, no branching."""
    o_ref[...] = (
        jnp.dot(x_ref[...], w_ref[...], preferred_element_type=jnp.float32)
        + b_ref[...].astype(jnp.float32)
    ).astype(o_ref.dtype)


def _linear_kernel_multi_k(x_ref, w_ref, b_ref, o_ref, acc_ref):
    """One (tm, tn) output tile; accumulates over the K grid axis."""
    k = pl.program_id(2)

    @pl.when(k == 0)
    def _init():
        # Seed the accumulator with the bias: epilogue becomes a pure store.
        acc_ref[...] = jnp.broadcast_to(
            b_ref[...].astype(jnp.float32), acc_ref.shape
        )

    acc_ref[...] += jnp.dot(
        x_ref[...], w_ref[...], preferred_element_type=jnp.float32
    )

    @pl.when(k == pl.num_programs(2) - 1)
    def _finalize():
        o_ref[...] = acc_ref[...].astype(o_ref.dtype)


def linear_forward(x, w, b, *, tm=256, tn=256, tk=512):
    """y = x @ w + b  with x:(B, D_in), w:(D_in, D_out), b:(1, D_out)."""
    B, D_in = x.shape
    D_out = w.shape[1]

    # Tile sizes: sublane-aligned (8) on M, lane-aligned (128) on N/K, but no
    # larger than the padded problem.
    tm_e = min(tm, _round_up(B, 8))
    tn_e = min(tn, _round_up(D_out, 128))
    tk_e = min(tk, _round_up(D_in, 128))

    Bp = _round_up(B, tm_e)
    Kp = _round_up(D_in, tk_e)
    Np = _round_up(D_out, tn_e)

    # Zero-pad to tile multiples (zeros contribute nothing to the matmul);
    # this makes the output lane-dense (last dim multiple of 128).
    xp = x if (Bp == B and Kp == D_in) else jnp.pad(x, ((0, Bp - B), (0, Kp - D_in)))
    wp = w if (Kp == D_in and Np == D_out) else jnp.pad(
        w, ((0, Kp - D_in), (0, Np - D_out))
    )
    bp = b if Np == D_out else jnp.pad(b, ((0, 0), (0, Np - D_out)))

    cost = pl.CostEstimate(
        flops=2 * Bp * Kp * Np,
        transcendentals=0,
        bytes_accessed=x.dtype.itemsize * (Bp * Kp + Kp * Np + Np + Bp * Np),
    )

    if Kp == tk_e:
        # ---- Single-K fast path: 2-D grid, no reduction axis, no scratch ----
        grid = (Bp // tm_e, Np // tn_e)
        out_padded = pl.pallas_call(
            _linear_kernel_single_k,
            out_shape=jax.ShapeDtypeStruct((Bp, Np), x.dtype),
            grid_spec=pltpu.PrefetchScalarGridSpec(
                num_scalar_prefetch=0,
                grid=grid,
                in_specs=[
                    pl.BlockSpec((tm_e, Kp), lambda i, j: (i, 0)),   # x tile
                    pl.BlockSpec((Kp, tn_e), lambda i, j: (0, j)),   # w tile
                    pl.BlockSpec((1, tn_e), lambda i, j: (0, j)),    # bias
                ],
                out_specs=pl.BlockSpec((tm_e, tn_e), lambda i, j: (i, j)),
            ),
            compiler_params=pltpu.CompilerParams(
                dimension_semantics=("parallel", "parallel"),
            ),
            cost_estimate=cost,
        )(xp, wp, bp)
    else:
        # ---- Multi-K path: 3-D grid with an f32 VMEM accumulator ----
        grid = (Bp // tm_e, Np // tn_e, Kp // tk_e)
        out_padded = pl.pallas_call(
            _linear_kernel_multi_k,
            out_shape=jax.ShapeDtypeStruct((Bp, Np), x.dtype),
            grid_spec=pltpu.PrefetchScalarGridSpec(
                num_scalar_prefetch=0,
                grid=grid,
                in_specs=[
                    pl.BlockSpec((tm_e, tk_e), lambda i, j, k: (i, k)),  # x tile
                    pl.BlockSpec((tk_e, tn_e), lambda i, j, k: (k, j)),  # w tile
                    pl.BlockSpec((1, tn_e), lambda i, j, k: (0, j)),     # bias
                ],
                out_specs=pl.BlockSpec((tm_e, tn_e), lambda i, j, k: (i, j)),
                scratch_shapes=[pltpu.VMEM((tm_e, tn_e), jnp.float32)],
            ),
            compiler_params=pltpu.CompilerParams(
                dimension_semantics=("parallel", "parallel", "arbitrary"),
            ),
            cost_estimate=cost,
        )(xp, wp, bp)

    # Strip padding back to the logical output shape.
    return out_padded[:B, :D_out]


if __name__ == "__main__":
    # Small shapes consistent with the module: input_dim=32, output_dim=16, batch=8.
    batch, input_dim, output_dim = 8, 32, 16

    key = jax.random.PRNGKey(0)
    kx, kw, kb = jax.random.split(key, 3)

    # Deterministic parameter init mirroring nn.Linear: U(-1/sqrt(in), 1/sqrt(in)).
    bound = 1.0 / jnp.sqrt(jnp.float32(input_dim))
    # Stored transposed relative to PyTorch: (input_dim, output_dim).
    w = jax.random.uniform(kw, (input_dim, output_dim), jnp.float32, -bound, bound)
    b = jax.random.uniform(kb, (1, output_dim), jnp.float32, -bound, bound)

    x = jax.random.normal(kx, (batch, input_dim), jnp.float32)

    y = linear_forward(x, w, b)
    jax.block_until_ready(y)

    # Correctness check against the pure-JAX reference (== PyTorch x @ W.T + b).
    y_ref = x @ w + b
    assert y.shape == (batch, output_dim)
    assert jnp.allclose(y, y_ref, atol=1e-5, rtol=1e-5)

    # Also exercise the multi-K (reduction-grid) path once to keep it validated.
    k2x, k2w, k2b = jax.random.split(jax.random.PRNGKey(1), 3)
    B2, Din2, Dout2 = 64, 1024, 256
    x2 = jax.random.normal(k2x, (B2, Din2), jnp.float32)
    w2 = jax.random.normal(k2w, (Din2, Dout2), jnp.float32) * 0.02
    b2 = jax.random.normal(k2b, (1, Dout2), jnp.float32)
    y2 = linear_forward(x2, w2, b2, tk=512)  # Kp=1024 > tk -> 2 K steps
    jax.block_until_ready(y2)
    assert jnp.allclose(y2, x2 @ w2 + b2, atol=1e-3, rtol=1e-3)

    print("KERNEL_OK")
</pallas_src>

<mosaic_0001>
module attributes {stable_mosaic.version = 11 : i64} {
  func.func @_linear_kernel_single_k(%arg0: i32, %arg1: i32, %arg2: memref<8x128xf32, #tpu.memory_space<vmem>>, %arg3: memref<128x128xf32, #tpu.memory_space<vmem>>, %arg4: memref<1x128xf32, #tpu.memory_space<vmem>>, %arg5: memref<8x128xf32, #tpu.memory_space<vmem>>) attributes {dimension_semantics = [#tpu.dimension_semantics<parallel>, #tpu.dimension_semantics<parallel>], iteration_bounds = array<i64: 1, 1>, scalar_prefetch = 0 : i64, scratch_operands = 0 : i64, tpu.core_type = #tpu.core_type<tc>, window_params = [{transform_indices = @transform_0, window_bounds = array<i64: 8, 128>}, {transform_indices = @transform_1, window_bounds = array<i64: 128, 128>}, {transform_indices = @transform_2, window_bounds = array<i64: 1, 128>}, {transform_indices = @transform_3, window_bounds = array<i64: 8, 128>}]} {
    %c0 = arith.constant 0 : index
    %c0_0 = arith.constant 0 : index
    %0 = vector.load %arg2[%c0, %c0_0] : memref<8x128xf32, #tpu.memory_space<vmem>>, vector<8x128xf32>
    %c0_1 = arith.constant 0 : index
    %c0_2 = arith.constant 0 : index
    %1 = vector.load %arg3[%c0_1, %c0_2] : memref<128x128xf32, #tpu.memory_space<vmem>>, vector<128x128xf32>
    %cst = arith.constant dense<0.000000e+00> : vector<8x128xf32>
    %2 = tpu.matmul %0, %1, %cst {dimension_numbers = #tpu.dot_dimension_numbers<[1], [0], [0], [1], [0, 0, 1, 1], [], []>} : vector<8x128xf32>, vector<128x128xf32>, vector<8x128xf32> -> vector<8x128xf32>
    %c0_3 = arith.constant 0 : index
    %c0_4 = arith.constant 0 : index
    %3 = vector.load %arg4[%c0_3, %c0_4] : memref<1x128xf32, #tpu.memory_space<vmem>>, vector<1x128xf32>
    %4 = vector.broadcast %3 : vector<1x128xf32> to vector<8x128xf32>
    %5 = arith.addf %2, %4 : vector<8x128xf32>
    %c0_5 = arith.constant 0 : index
    %c0_6 = arith.constant 0 : index
    %6 = vector.load %arg5[%c0_5, %c0_6] : memref<8x128xf32, #tpu.memory_space<vmem>>, vector<8x128xf32>
    tpu.vector_store %arg5[%c0_5, %c0_6], %5 {strides = array<i32>} : memref<8x128xf32, #tpu.memory_space<vmem>>, vector<8x128xf32>,
    return
  }
  func.func @transform_0(%arg0: i32, %arg1: i32) -> (i32, i32) {
    %c0_i32 = arith.constant 0 : i32
    %c0_i32_0 = arith.constant 0 : i32
    return %arg0, %c0_i32 : i32, i32
  }
  func.func @transform_1(%arg0: i32, %arg1: i32) -> (i32, i32) {
    %c0_i32 = arith.constant 0 : i32
    %c0_i32_0 = arith.constant 0 : i32
    return %c0_i32, %arg1 : i32, i32
  }
  func.func @transform_2(%arg0: i32, %arg1: i32) -> (i32, i32) {
    %c0_i32 = arith.constant 0 : i32
    %c0_i32_0 = arith.constant 0 : i32
    return %c0_i32, %arg1 : i32, i32
  }
  func.func @transform_3(%arg0: i32, %arg1: i32) -> (i32, i32) {
    %c0_i32 = arith.constant 0 : i32
    return %arg0, %arg1 : i32, i32
  }
}

</mosaic_0001>

<bundles_post_ra>
// kernel: tpu_custom_call.1
= control target key start
LH: loop header
LB: loop body
LE: loop exit
PB: predicated region body
PF: predicated region fallthrough
CT: control target
= control target key end

     0   :  { %8 = vsyncpa [#allocation3], 0  ;;  %s226_s0 = inlined_call_operand.hbm [shape: f32[8,128], index: 0, kind: input, shape index: {}]   ;;  %s227_s1 = inlined_call_operand.hbm [shape: f32[128,128], index: 1, kind: input, shape index: {}]   ;;  %s228_s2 = inlined_call_operand.vmem [shape: f32[1,128], index: 2, kind: input, shape index: {}]   ;;  %s229_s3 = inlined_call_operand.hbm [shape: f32[8,128], index: 3, kind: output, shape index: {}]  }
   0x1   :  { %9 = vsyncpa [#allocation6], 0 }
   0x2   :  { %10 = vsyncpa [#allocation4], 0  ;;  %s16_s14 = sshll.u32 %s226_s0, 4  ;;  %s189_s15 = smov [#allocation2]   ;;  %s17_s14 = int_to_ptr.hbm [resolvable:$true] %s16_s14 }
   0x3   :  { %s18_s16 = sshll.u32 %s189_s15, 4  ;;  %s26_s19 = sshll.u32 %s227_s1, 4  ;;  %s19_s16 = int_to_ptr.vmem [resolvable:$true] %s18_s16  ;;  %s27_s19 = int_to_ptr.hbm [resolvable:$true] %s26_s19 }
   0x4   :  { %21 = dma.hbm_to_vmem [thread:$0]  %s17_s14, 128, %s19_s16, [#allocation3]  }
   0x5   :  { %s190_s20 = smov [#allocation5]   ;;  %s191_s22 = smov 128  }
   0x6   :  { %s28_s21 = sshll.u32 %s190_s20, 4  ;;  %s192_s23 = smov 8   ;;  %s29_s21 = int_to_ptr.vmem [resolvable:$true] %s28_s21 }
   0x7   :  { %34 = dma.hbm_to_vmem [thread:$0]  %s27_s19, 2048, %s29_s21, [#allocation6], %s191_s22, %s191_s22, %s192_s23  }
   0x8   :  { %183 = dma.done.wait [#allocation3], 128  }
   0x9   :  { %184 = vsyncadd [#allocation3], 4294967168 }
   0xa   :  { %185 = dma.done.wait [#allocation6], 2048  }
   0xb   :  { %186 = vsyncadd [#allocation6], 4294965248  ;;  %v61_v0 = vld [vmem:[#allocation5 + $0x78] sm:$0xff]  ;;  %v60_v1 = vld [vmem:[#allocation5 + $0x70] sm:$0xff]  ;;  %s193_s24 = smov [#allocation7]   ;;  %s94_s28 = sshll.u32 %s229_s3, 4  ;;  %s95_s28 = int_to_ptr.hbm [resolvable:$true] %s94_s28 }
   0xc   :  { %66 = vmatpush.msra.mxu0 %v61_v0  ;;  %v59_v2 = vld [vmem:[#allocation5 + $0x68] sm:$0xff]  ;;  %v58_v3 = vld [vmem:[#allocation5 + $0x60] sm:$0xff]  ;;  %v57_v4 = vld [vmem:[#allocation5 + $0x58] sm:$0xff]  ;;  %s92_s25 = sshll.u32 %s193_s24, 4  ;;  %s93_s25 = int_to_ptr.vmem [resolvable:$true] %s92_s25 }
   0xd   :  { %v56_v5 = vld [vmem:[#allocation5 + $0x50] sm:$0xff]  ;;  %v55_v6 = vld [vmem:[#allocation5 + $0x48] sm:$0xff]  ;;  %v54_v7 = vld [vmem:[#allocation5 + $0x40] sm:$0xff] }
   0xe   :  { %67 = vmatpush.msra.mxu0 %v60_v1  ;;  %v53_v8 = vld [vmem:[#allocation5 + $0x38] sm:$0xff]  ;;  %v52_v9 = vld [vmem:[#allocation5 + $0x30] sm:$0xff]  ;;  %v51_v10 = vld [vmem:[#allocation5 + $0x28] sm:$0xff] }
   0xf   :  { %v50_v11 = vld [vmem:[#allocation5 + $0x20] sm:$0xff]  ;;  %v49_v12 = vld [vmem:[#allocation5 + $0x18] sm:$0xff]  ;;  %v48_v13 = vld [vmem:[#allocation5 + $0x10] sm:$0xff] }
  0x10   :  { %68 = vmatpush.msra.mxu0 %v59_v2  ;;  %v47_v14 = vld [vmem:[#allocation5 + $0x8] sm:$0xff]  ;;  %v46_v15 = vld [vmem:[#allocation5] sm:$0xff]  ;;  %v45_v16 = vld [vmem:[#allocation2] sm:$0xff] }
  0x11   :  { %v110_v17 = vld [vmem:[%s228_s2] ss:$0 sm:$0xff] }
  0x12   :  { %69 = vmatpush.msra.mxu0 %v58_v3 }
  0x14   :  { %70 = vmatpush.msra.mxu0 %v57_v4 }
  0x16   :  { %71 = vmatpush.msra.mxu0 %v56_v5 }
  0x18   :  { %72 = vmatpush.msra.mxu0 %v55_v6 }
  0x1a   :  { %73 = vmatpush.msra.mxu0 %v54_v7 }
  0x1c   :  { %74 = vmatpush.msra.mxu0 %v53_v8 }
  0x1e   :  { %75 = vmatpush.msra.mxu0 %v52_v9 }
  0x20   :  { %76 = vmatpush.msra.mxu0 %v51_v10 }
  0x22   :  { %77 = vmatpush.msra.mxu0 %v50_v11 }
  0x24   :  { %78 = vmatpush.msra.mxu0 %v49_v12 }
  0x26   :  { %79 = vmatpush.msra.mxu0 %v48_v13 }
  0x28   :  { %80 = vmatpush.msra.mxu0 %v47_v14 }
  0x2a   :  { %81 = vmatpush.msra.mxu0 %v46_v15 }
  0x2b   :  { %82 = vmatmul.f32.vlgmr.msra.gmra.mxu0 %v45_v16 }
  0xa8   :  { %v83_v18 = vpop.f32.mrf.mxu0 }
  0xa9   :  { %v84_v19 = vadd.f32 %v110_v17, %v83_v18 }
  0xab   :  { %86 = vst [vmem:[#allocation7] sm:$0xff] %v84_v19 }
  0xac   :  { %97 = dma.vmem_to_hbm [thread:$0]  %s93_s25, 128, %s95_s28, [#allocation4]  }
  0xad   :  { %187 = dma.done.wait [#allocation4], 128  }
  0xae   :  { %188 = vsyncadd [#allocation4], 4294967168 }
  0xaf   :  { %102 = vsyncpa [#allocation3], 1 }
  0xb0   :  { %103 = vsyncpa [#allocation6], 1 }
  0xb1   :  { %104 = vsyncpa [#allocation4], 1 }

</bundles_post_ra>
